<compile_context>
chip_gen: v7x
topology: tpu7x:2x2x1
jax: 0.10.0
libtpu: 0.0.40
codegen_flags: <defaults>
</compile_context>

<pallas_src>
import functools

import jax
import jax.numpy as jnp
from jax.experimental import pallas as pl
from jax.experimental.pallas import tpu as pltpu


# ------------------------------- kernel ------------------------------------ #

def _column_attention_kernel(x_ref, w_ref, o_ref, *, r, a, compute_dtype):
    """Fused QKV projection + attention for a block of Bb batch elements.

    x_ref: (Bb*N, C)  activations, pre-flattened to matmul layout
    w_ref: (C, 3C)    fused [Wq^T | Wk^T | Wv^T] projection weight
    o_ref: (Bb, r*a)  lane-dense output slab
    """
    _, c = x_ref.shape
    bb = o_ref.shape[0]
    f32 = jnp.float32
    exact = jnp.dtype(compute_dtype) == jnp.dtype(jnp.float32)

    # Single MXU pass over x for q, k and v: (Bb*N, C) @ (C, 3C), f32 accum.
    xf = x_ref[...].astype(compute_dtype)
    qkv = jnp.dot(xf, w_ref[...], preferred_element_type=f32)      # (Bb*N, 3C)

    # Static lane slices (the stride-3 q/k/v interleave was folded into the
    # one-time weight repack), then row-major re-tiling (Bb*N, C) -> (Bb, r, a)
    # which, with r*a == N*C, reproduces torch's reshape(B, r, a, 3) exactly.
    q = qkv[:, :c].reshape(bb, r, a)
    k = qkv[:, c:2 * c].reshape(bb, r, a)
    v = qkv[:, 2 * c:].reshape(bb, r, a)

    # scores = q @ k^T per batch element: contract on the last axes directly
    # (no explicit k transpose through the XLU).
    scores = jnp.einsum("bqd,bkd->bqk",
                        q.astype(compute_dtype), k.astype(compute_dtype),
                        preferred_element_type=f32)                 # (Bb, r, r)

    # Numerically stable softmax in f32.  f32 path: exact divide (parity with
    # torch softmax); bf16 fast path: EUP approximate reciprocal (free slot).
    mmax = jnp.max(scores, axis=-1, keepdims=True)
    e = jnp.exp(scores - mmax)
    denom = jnp.sum(e, axis=-1, keepdims=True)
    if exact:
        p = e / denom
    else:
        p = e * pl.reciprocal(denom, approx=True)

    out = jnp.einsum("bqk,bkd->bqd",
                     p.astype(compute_dtype), v.astype(compute_dtype),
                     preferred_element_type=f32)                    # (Bb, r, a)

    # Lane-dense store: last dim r*a instead of a, avoiding masked partial
    # stores when a < 128.
    o_ref[...] = out.reshape(bb, r * a).astype(o_ref.dtype)


# ------------------------------ helpers ------------------------------------ #

def prepare_qkv_weights(weight, compute_dtype=jnp.bfloat16):
    """One-time repack of the torch Linear weight (shape (3C, C)) into a single
    (C, 3C) matrix [Wq^T | Wk^T | Wv^T].

    Output feature o lands in q/k/v according to o % 3 after the module's
    reshape(B, r, a, 3), so splitting the weight ROWS at stride 3 gives
    contiguous q/k/v projections; transposing + concatenating once lets the
    kernel do a single x @ W_t matmul (no per-call weight.T, no stride-3
    gather on activations).  In a real model this runs at parameter-init time.
    """
    wq_t = weight[0::3, :].T
    wk_t = weight[1::3, :].T
    wv_t = weight[2::3, :].T
    return jnp.concatenate([wq_t, wk_t, wv_t], axis=1).astype(compute_dtype)


def _vmem_limit_bytes():
    """Per-chip scoped-VMEM budget: 3/4 of physical capacity when queryable,
    otherwise a v7x-safe 48 MiB (v7x has the smallest VMEM at 64 MiB)."""
    try:
        cap = int(pltpu.get_tpu_info().vmem_capacity_bytes)
    except Exception:
        cap = 64 << 20
    return max(32 << 20, (cap * 3) // 4)


def _choose_batch_block(batch, n, c, r, a, *, budget_bytes,
                        in_itemsize, out_itemsize, compute_itemsize):
    """Largest batch block whose live VMEM fits the budget.

    Counts double-buffered x/out blocks, the f32 qkv projection result, the
    compute-dtype q/k/v/p copies, the f32 scores + exp intermediates and the
    f32 attention output, and subtracts the (double-buffered) resident weight.
    Blocks smaller than the full batch are kept multiples of 8 so the 2-D
    lane-dense input/output blocks stay sublane-aligned.
    """
    per_b = (2 * n * c * in_itemsize          # double-buffered x rows
             + 2 * r * a * out_itemsize       # double-buffered lane-dense out
             + 3 * n * c * 4                  # f32 q, k, v projection result
             + 3 * r * a * compute_itemsize   # q/k/v cast for attention matmuls
             + 2 * r * r * 4                  # f32 scores + exp
             + r * r * compute_itemsize       # p cast for attn @ v
             + r * a * 4)                     # f32 attention output
    resident = 2 * c * (3 * c) * compute_itemsize   # grid-invariant weight
    usable = max(budget_bytes - resident, per_b)
    bmax = max(1, min(batch, usable // per_b))

    divisors = [d for d in range(1, batch + 1) if batch % d == 0]
    valid = [d for d in divisors if d <= bmax and (d == batch or d % 8 == 0)]
    if not valid:                         # tiny budget: run the whole batch
        valid = [batch]
    # Prefer >= 2 grid steps when each step still feeds the MXU >= 256 rows:
    # lets v7x shard the 'parallel' axis across its 2 TensorCores, and costs
    # only ~0.35 us/step on single-TC v5e/v6e.
    multi = [d for d in valid if batch // d >= 2 and d * n >= 256]
    return max(multi) if multi else max(valid)


# ------------------------------ wrapper ------------------------------------- #

def column_attention(x, weight, size, *, compute_dtype=jnp.bfloat16,
                     block_b=None):
    """x: (B, N, C); weight: (3C, C) torch Linear layout; size = (r, a)."""
    r, a = size
    batch, n, c = x.shape
    assert n * c == r * a, "size must satisfy r * a == N * C"

    w_t = prepare_qkv_weights(weight, compute_dtype)          # (C, 3C)
    out_dtype = x.dtype
    in_itemsize = jnp.dtype(x.dtype).itemsize
    out_itemsize = jnp.dtype(out_dtype).itemsize
    compute_itemsize = jnp.dtype(compute_dtype).itemsize

    vmem_limit = int(_vmem_limit_bytes())
    if block_b is None:
        block_b = _choose_batch_block(
            batch, n, c, r, a, budget_bytes=vmem_limit,
            in_itemsize=in_itemsize, out_itemsize=out_itemsize,
            compute_itemsize=compute_itemsize)
    grid = (batch // block_b,)

    kernel = functools.partial(_column_attention_kernel,
                               r=r, a=a, compute_dtype=compute_dtype)

    flops = 2 * batch * n * c * (3 * c) + 4 * batch * r * r * a
    bytes_accessed = (batch * n * c * in_itemsize
                      + c * 3 * c * compute_itemsize
                      + batch * r * a * out_itemsize)
    cost = pl.CostEstimate(flops=int(flops),
                           transcendentals=int(batch * r * r),
                           bytes_accessed=int(bytes_accessed))

    out2d = pl.pallas_call(
        kernel,
        out_shape=jax.ShapeDtypeStruct((batch, r * a), out_dtype),
        grid=grid,
        in_specs=[
            pl.BlockSpec((block_b * n, c), lambda i: (i, 0)),   # x (flattened)
            pl.BlockSpec((c, 3 * c), lambda i: (0, 0)),         # fused weight
        ],
        out_specs=pl.BlockSpec((block_b, r * a), lambda i: (i, 0)),
        compiler_params=pltpu.CompilerParams(
            dimension_semantics=("parallel",),
            vmem_limit_bytes=vmem_limit),
        cost_estimate=cost,
    )(x.reshape(batch * n, c), w_t)

    return out2d.reshape(batch, r, a)


# ------------------------------ reference ----------------------------------- #

def column_attention_ref(x, weight, size, compute_dtype=jnp.float32):
    """Plain-JAX replica of the torch module (optionally with matching
    compute-dtype casts on matmul inputs, f32 accumulation, exact softmax)."""
    r, a = size
    batch, n, c = x.shape
    xc = x.astype(compute_dtype)
    wc = weight.astype(compute_dtype)
    qkv = jnp.einsum("bnc,oc->bno", xc, wc,
                     preferred_element_type=jnp.float32)
    qkv = qkv.reshape(batch, r, a, 3)
    q, k, v = qkv[..., 0], qkv[..., 1], qkv[..., 2]
    scores = jnp.einsum("bia,bja->bij",
                        q.astype(compute_dtype), k.astype(compute_dtype),
                        preferred_element_type=jnp.float32)
    p = jax.nn.softmax(scores, axis=-1)
    return jnp.einsum("bij,bja->bia",
                      p.astype(compute_dtype), v.astype(compute_dtype),
                      preferred_element_type=jnp.float32)


# -------------------------------- main -------------------------------------- #

if __name__ == "__main__":
    B, N, C = 2, 8, 32          # (bs, h, w) in the module's docstring
    r, a = 8, 32                # must satisfy r * a == N * C
    key = jax.random.PRNGKey(0)
    kx, kw = jax.random.split(key)

    x = jax.random.normal(kx, (B, N, C), dtype=jnp.float32)
    # deterministic nn.Linear weight, shape (3*C, C), no bias
    weight = jax.random.normal(kw, (3 * C, C), dtype=jnp.float32) * (1.0 / jnp.sqrt(C))

    # 1) f32 compute path (exact softmax divide) vs plain-JAX reference.
    #    Tolerance is set so it is robust to backend-default f32 matmul
    #    precision; pin precision=HIGHEST on both sides for tighter parity.
    out_f32 = jax.block_until_ready(
        column_attention(x, weight, (r, a), compute_dtype=jnp.float32))
    ref_f32 = column_attention_ref(x, weight, (r, a), compute_dtype=jnp.float32)
    assert out_f32.shape == (B, r, a)
    assert jnp.allclose(out_f32, ref_f32, atol=5e-2, rtol=5e-2), \
        "f32 path mismatch vs reference"

    # 2) bf16 fast path (bf16 MXU matmuls, f32 accumulation, f32 softmax with
    #    EUP reciprocal) vs a reference applying the same bf16 casts.
    out_bf16 = jax.block_until_ready(
        column_attention(x, weight, (r, a), compute_dtype=jnp.bfloat16))
    ref_bf16 = column_attention_ref(x, weight, (r, a), compute_dtype=jnp.bfloat16)
    assert out_bf16.shape == (B, r, a)
    assert jnp.allclose(out_bf16, ref_bf16, atol=2e-2, rtol=2e-2), \
        "bf16 path mismatch vs matched reference"

    print("KERNEL_OK")
</pallas_src>

<mosaic_0001>
module attributes {stable_mosaic.version = 11 : i64} {
  func.func @_column_attention_kernel(%arg0: i32, %arg1: memref<16x32xf32, #tpu.memory_space<vmem>>, %arg2: memref<32x96xf32, #tpu.memory_space<vmem>>, %arg3: memref<2x256xf32, #tpu.memory_space<vmem>>) attributes {dimension_semantics = [#tpu.dimension_semantics<parallel>], iteration_bounds = array<i64: 1>, scalar_prefetch = 0 : i64, scratch_operands = 0 : i64, tpu.core_type = #tpu.core_type<tc>, window_params = [{transform_indices = @transform_0, window_bounds = array<i64: 16, 32>}, {pipeline_mode = #tpu.pipeline_mode<synchronous>, transform_indices = @transform_1, window_bounds = array<i64: 32, 96>}, {transform_indices = @transform_2, window_bounds = array<i64: 2, 256>}]} {
    %c0 = arith.constant 0 : index
    %c0_0 = arith.constant 0 : index
    %0 = vector.load %arg1[%c0, %c0_0] : memref<16x32xf32, #tpu.memory_space<vmem>>, vector<16x32xf32>
    %c0_1 = arith.constant 0 : index
    %c0_2 = arith.constant 0 : index
    %1 = vector.load %arg2[%c0_1, %c0_2] : memref<32x96xf32, #tpu.memory_space<vmem>>, vector<32x96xf32>
    %cst = arith.constant dense<0.000000e+00> : vector<16x96xf32>
    %2 = tpu.matmul %0, %1, %cst {dimension_numbers = #tpu.dot_dimension_numbers<[1], [0], [0], [1], [0, 0, 1, 1], [], []>} : vector<16x32xf32>, vector<32x96xf32>, vector<16x96xf32> -> vector<16x96xf32>
    %3 = vector.extract_strided_slice %2 {offsets = [0, 0], sizes = [16, 32], strides = [1, 1]} : vector<16x96xf32> to vector<16x32xf32>
    %4 = vector.shape_cast %3 : vector<16x32xf32> to vector<2x8x32xf32>
    %5 = vector.extract_strided_slice %2 {offsets = [0, 32], sizes = [16, 32], strides = [1, 1]} : vector<16x96xf32> to vector<16x32xf32>
    %6 = vector.shape_cast %5 : vector<16x32xf32> to vector<2x8x32xf32>
    %7 = vector.extract_strided_slice %2 {offsets = [0, 64], sizes = [16, 32], strides = [1, 1]} : vector<16x96xf32> to vector<16x32xf32>
    %8 = vector.shape_cast %7 : vector<16x32xf32> to vector<2x8x32xf32>
    "tpu.trace_start"() <{level = 10 : i32, message = "bqd,bkd->bqk"}> : () -> ()
    %cst_3 = arith.constant dense<0.000000e+00> : vector<2x8x8xf32>
    %9 = tpu.matmul %4, %6, %cst_3 {dimension_numbers = #tpu.dot_dimension_numbers<[2], [2], [1], [1], [0, 0, 0, 1, 1, 1], [0], [0]>} : vector<2x8x32xf32>, vector<2x8x32xf32>, vector<2x8x8xf32> -> vector<2x8x8xf32>
    "tpu.trace_stop"() : () -> ()
    %cst_4 = arith.constant dense<0xFF800000> : vector<2x8xf32>
    %10 = vector.multi_reduction <maximumf>, %9, %cst_4 [2] : vector<2x8x8xf32> to vector<2x8xf32>
    %11 = vector.shape_cast %10 : vector<2x8xf32> to vector<2x8x1xf32>
    %12 = vector.broadcast %11 : vector<2x8x1xf32> to vector<2x8x8xf32>
    %13 = arith.subf %9, %12 : vector<2x8x8xf32>
    %14 = math.exp %13 : vector<2x8x8xf32>
    %cst_5 = arith.constant dense<0.000000e+00> : vector<2x8xf32>
    %15 = vector.multi_reduction <add>, %14, %cst_5 [2] : vector<2x8x8xf32> to vector<2x8xf32>
    %16 = vector.shape_cast %15 : vector<2x8xf32> to vector<2x8x1xf32>
    %17 = vector.broadcast %16 : vector<2x8x1xf32> to vector<2x8x8xf32>
    %18 = arith.divf %14, %17 : vector<2x8x8xf32>
    "tpu.trace_start"() <{level = 10 : i32, message = "bqk,bkd->bqd"}> : () -> ()
    %cst_6 = arith.constant dense<0.000000e+00> : vector<2x8x32xf32>
    %19 = tpu.matmul %18, %8, %cst_6 {dimension_numbers = #tpu.dot_dimension_numbers<[2], [1], [1], [2], [0, 0, 0, 1, 1, 2], [0], [0]>} : vector<2x8x8xf32>, vector<2x8x32xf32>, vector<2x8x32xf32> -> vector<2x8x32xf32>
    "tpu.trace_stop"() : () -> ()
    %20 = vector.shape_cast %19 : vector<2x8x32xf32> to vector<2x256xf32>
    %c0_7 = arith.constant 0 : index
    %c0_8 = arith.constant 0 : index
    %21 = vector.load %arg3[%c0_7, %c0_8] : memref<2x256xf32, #tpu.memory_space<vmem>>, vector<2x256xf32>
    tpu.vector_store %arg3[%c0_7, %c0_8], %20 {strides = array<i32>} : memref<2x256xf32, #tpu.memory_space<vmem>>, vector<2x256xf32>,
    return
  }
  func.func @transform_0(%arg0: i32) -> (i32, i32) {
    %c0_i32 = arith.constant 0 : i32
    %c0_i32_0 = arith.constant 0 : i32
    return %arg0, %c0_i32 : i32, i32
  }
  func.func @transform_1(%arg0: i32) -> (i32, i32) {
    %c0_i32 = arith.constant 0 : i32
    %c0_i32_0 = arith.constant 0 : i32
    %c0_i32_1 = arith.constant 0 : i32
    return %c0_i32, %c0_i32_0 : i32, i32
  }
  func.func @transform_2(%arg0: i32) -> (i32, i32) {
    %c0_i32 = arith.constant 0 : i32
    %c0_i32_0 = arith.constant 0 : i32
    return %arg0, %c0_i32 : i32, i32
  }
}

</mosaic_0001>

<bundles_post_ra>
// kernel: tpu_custom_call.1
= control target key start
LH: loop header
LB: loop body
LE: loop exit
PB: predicated region body
PF: predicated region fallthrough
CT: control target
= control target key end

     0   :  { %7 = vsyncpa [#allocation3], 0  ;;  %s840_s0 = inlined_call_operand.hbm [shape: f32[16,32], index: 0, kind: input, shape index: {}]   ;;  %s841_s1 = inlined_call_operand.hbm [shape: f32[32,96], index: 1, kind: input, shape index: {}]   ;;  %s842_s2 = inlined_call_operand.hbm [shape: f32[2,256], index: 2, kind: output, shape index: {}]  }
   0x1   :  { %8 = vsyncpa [#allocation6], 0 }
   0x2   :  { %9 = vsyncpa [#allocation4], 0  ;;  %s737_s9 = smov [#allocation2]   ;;  %s665_s13 = scalar_lea.hbm %s840_s0, 256 }
   0x3   :  { %s15_s10 = sshll.u32 %s737_s9, 4  ;;  %p666_p0 = scmp.ne.s32.totalorder %s840_s0, %s665_s13  ;;  %s16_s10 = int_to_ptr.vmem [resolvable:$true] %s15_s10 }
   0x4   :  { %p669_p1 = scmp.lt.u32.totalorder %s665_s13, %s840_s0 }
   0x6   :  { %p671_p2 = pnand %p669_p1, %p666_p0 }
   0x8   :  { %674 = shalt.err (!%p671_p2)
}
   0x9   :  { %s675_s18 = scalar_lea.vmem %s16_s10, 256  ;;  %p680_p4 = scmp.lt.s32.totalorder %s16_s10, %s16_s10 }
   0xa   :  { %p676_p3 = scmp.ne.s32.totalorder %s16_s10, %s675_s18  ;;  %p681_p5 = scmp.lt.s32.totalorder %s675_s18, %s675_s18 }
   0xc   :  { %p682_p6 = por %p681_p5, %p680_p4 }
   0xe   :  { %p683_p7 = pnand %p682_p6, %p676_p3 }
  0x10   :  { %686 = shalt.err (!%p683_p7)
}
  0x11   :  { %s738_s19 = smov 128   ;;  %s739_s20 = smov 8  }
  0x12   :  { %21 = dma.hbm_to_vmem [thread:$0]  %s840_s0, 256, %s16_s10, [#allocation3], %s738_s19, %s738_s19, %s739_s20  }
  0x13   :  { %s740_s23 = smov [#allocation5]   ;;  %s687_s27 = scalar_lea.hbm %s841_s1, 512 }
  0x14   :  { %s27_s24 = sshll.u32 %s740_s23, 4  ;;  %p688_p8 = scmp.ne.s32.totalorder %s841_s1, %s687_s27  ;;  %s28_s24 = int_to_ptr.vmem [resolvable:$true] %s27_s24 }
  0x15   :  { %p691_p9 = scmp.lt.u32.totalorder %s687_s27, %s841_s1 }
  0x17   :  { %p693_p10 = pnand %p691_p9, %p688_p8 }
  0x19   :  { %696 = shalt.err (!%p693_p10)
}
  0x1a   :  { %s697_s4 = scalar_lea.vmem %s28_s24, 512  ;;  %p702_p12 = scmp.lt.s32.totalorder %s28_s24, %s28_s24 }
  0x1b   :  { %p698_p11 = scmp.ne.s32.totalorder %s28_s24, %s697_s4  ;;  %p703_p13 = scmp.lt.s32.totalorder %s697_s4, %s697_s4 }
  0x1d   :  { %p704_p0 = por %p703_p13, %p702_p12 }
  0x1f   :  { %p705_p1 = pnand %p704_p0, %p698_p11 }
  0x21   :  { %708 = shalt.err (!%p705_p1)
}
  0x22   :  { %33 = dma.hbm_to_vmem [thread:$0]  %s841_s1, 512, %s28_s24, [#allocation6], %s738_s19, %s738_s19, %s739_s20  }
  0x23   :  { %731 = dma.done.wait [#allocation3], 256  }
  0x24   :  { %732 = vsyncadd [#allocation3], 4294967040 }
  0x25   :  { %733 = dma.done.wait [#allocation6], 512  }
  0x26   :  { %734 = vsyncadd [#allocation6], 4294966784  ;;  %vm46_vm0 = vcmask 261120   ;;  %v42_v0 = vld [vmem:[#allocation5] sm:$0xff]  ;;  %v43_v1 = vld [vmem:[#allocation5 + $0x8] sm:$0xff]  ;;  %v741_v8 = vmov 0.0   ;;  %v461_v39 = vlaneseq }
  0x27   :  { %v44_v2 = vld [vmem:[#allocation5 + $0x10] sm:$0xff]  ;;  %v637_v3 = vpack.c.bf16 %v43_v1, %v42_v0  ;;  %v45_v4 = vld [vmem:[#allocation5 + $0x18] sm:$0xff]  ;;  %617 = vmatprep.subr.mxu1 %v741_v8  ;;  %vm742_vm1 = vmmov 0   ;;  %s743_s1 = smov 96   ;;  %vm282_vm2 = vcmask 64512   ;;  %s744_s6 = smov 64  }
  0x28   :  { %v40_v5 = vld [vmem:[#allocation2] sm:$0xff]  ;;  %v641_v6 = vpack.c.bf16 %v45_v4, %v44_v2  ;;  %v41_v7 = vld [vmem:[#allocation2 + $0x8] sm:$0xff]  ;;  %619 = vmatprep.mubr.msk.f32.mxu1 %vm742_vm1, %v741_v8  ;;  %v745_v37 = vmov 1983009808   ;;  %v462_v41 = vshrl.u32 %v461_v39, 7  ;;  %s747_s7 = smov 32  }
  0x29   :  { %614 = vmatprep.mubr.msk.f32.mxu0 %vm46_vm0, %v40_v5  ;;  %638 = vmatprep.subr.bf16.mxu0 %v637_v3  ;;  %v459_v38 = vunpack.c.l.s4 %v745_v37  ;;  %v746_v42 = vmov 1934713408   ;;  %vm548_vm3 = vcmask 523264   ;;  %vm550_vm4 = vcmask 785408   ;;  %s748_s8 = smov [#allocation7]  }
  0x2a   :  { %640 = vmatpush3.bf16.msra.mxu0 %v637_v3  ;;  %v490_v43 = vunpack.c.l.s4 %v746_v42  ;;  %s573_s9 = sshll.u32 %s748_s8, 4  ;;  %s574_s9 = int_to_ptr.vmem [resolvable:$true] %s573_s9 }
  0x2b   :  { %642 = vmatprep.subr.bf16.mxu0 %v641_v6  ;;  %v460_v40 = vunpack.c.0.s8 %v459_v38  ;;  %s709_s10 = scalar_lea.vmem %s574_s9, 64  ;;  %p714_p3 = scmp.lt.s32.totalorder %s574_s9, %s574_s9 }
  0x2c   :  { %v491_v47 = vunpack.c.0.s8 %v490_v43  ;;  %p710_p2 = scmp.ne.s32.totalorder %s574_s9, %s709_s10  ;;  %p715_p4 = scmp.lt.s32.totalorder %s709_s10, %s709_s10 }
  0x2d   :  { %v463_v45 = vsub.s32 %v460_v40, %v462_v41 }
  0x2e   :  { %644 = vmatpush3.bf16.msra.mxu0 %v641_v6  ;;  %v494_v53 = vsub.s32 %v491_v47, %v462_v41  ;;  %p716_p5 = por %p715_p4, %p714_p3 }
  0x2f   :  { %627 = vmatprep.subr.mxu0 %v741_v8 }
  0x30   :  { %p717_p6 = pnand %p716_p5, %p710_p2 }
  0x31   :  { %615 = vmatmul.mubr.msk.f32.vlgmr.msra.gmra.mrb[0].mxu0 %vm46_vm0, %v41_v7 }
  0x32   :  { %629 = vmatprep.mubr.msk.f32.mxu0 %vm742_vm1, %v741_v8 }
 0x104   :  { %v616_v9 = vpop.f32.mrb[0].mxu0 }
 0x105   :  { %v119_v10 = vpop.f32.mrb[1].mxu0 }
 0x106   :  { %129 = vrot.lane.b32.xlu0 %v119_v10, %s743_s1 }
 0x10a   :  { %206 = vrot.lane.b32.xlu0 %v616_v9, %s743_s1 }
 0x178   :  { %v130_v11 = vpop.permute.xlu0 %129 }
 0x179   :  { %618 = vmatpush3.xpose.msk.msra.mxu1 %vm46_vm0, %v130_v11 }
 0x17a   :  { %622 = vmatprep.subr.mxu1 %v741_v8 }
 0x17c   :  { %620 = vmatmul.mubr.msk.f32.vlgmr.msra.gmra.mrb[0].mxu1 %vm46_vm0, %v119_v10  ;;  %v207_v12 = vpop.permute.xlu0 %206 }
 0x17d   :  { %623 = vmatpush3.xpose.msk.msra.mxu1 %vm46_vm0, %v207_v12  ;;  %624 = vmatprep.mubr.msk.f32.mxu1 %vm742_vm1, %v741_v8 }
 0x17e   :  { %632 = vmatprep.subr.mxu1 %v741_v8 }
 0x180   :  { %625 = vmatmul.mubr.msk.f32.vlgmr.msra.gmra.mrb[2].mxu1 %vm46_vm0, %v616_v9 }
 0x181   :  { %634 = vmatprep.mubr.msk.f32.mxu1 %vm742_vm1, %v741_v8 }
 0x24f   :  { %v201_v13 = vpop.f32.mrb[0].mxu1 }
 0x250   :  { %v621_v14 = vpop.f32.mrb[1].mxu1  ;;  %v283_v15 = vsel %vm282_vm2, %v201_v13, -inf }
 0x251   :  { %284 = vmax.xlane.f32.xlu1 %v283_v15 }
 0x253   :  { %v278_v16 = vpop.f32.mrb[2].mxu1 }
 0x254   :  { %v626_v17 = vpop.f32.mrb[3].mxu1  ;;  %v286_v18 = vsel %vm282_vm2, %v278_v16, -inf }
 0x255   :  { %287 = vmax.xlane.f32.xlu1 %v286_v18 }
 0x266   :  { %305 = vrot.lane.b32.xlu1 %v119_v10, %s744_s6 }
 0x2de   :  { %v285_v19 = vpop.xlane.xlu1 %284 }
 0x2df   :  { %v289_v20 = vsub.f32 %v201_v13, %v285_v19 }
 0x2e1   :  { %v291_v21 = vmul.f32 1.442695, %v289_v20 }
 0x2e2   :  { %v288_v22 = vpop.xlane.xlu1 %287 }
 0x2e3   :  { %657 = vpow2.f32 %v291_v21  ;;  %v290_v23 = vsub.f32 %v278_v16, %v288_v22 }
 0x2e5   :  { %v293_v24 = vmul.f32 1.442695, %v290_v23 }
 0x2e6   :  { %v306_v25 = vpop.permute.xlu1 %305 }
 0x2e7   :  { %659 = vpow2.f32 %v293_v24  ;;  %628 = vmatpush3.msra.mxu0 %v306_v25 }
 0x2ed   :  { %v658_v26 = vpop.eup %657 }
 0x2ee   :  { %v295_v27 = vsel %vm282_vm2, %v658_v26, 0.0 }
 0x2ef   :  { %296 = vadd.xlane.f32.xlu0 %v295_v27 }
 0x2f1   :  { %v660_v28 = vpop.eup %659 }
 0x2f2   :  { %v298_v29 = vsel %vm282_vm2, %v660_v28, 0.0 }
 0x2f3   :  { %299 = vadd.xlane.f32.xlu1 %v298_v29 }
 0x304   :  { %381 = vrot.lane.b32.xlu1 %v616_v9, %s744_s6 }
 0x37c   :  { %v297_v30 = vpop.xlane.xlu0 %296 }
 0x37d   :  { %661 = vrcp.f32 %v297_v30 }
 0x380   :  { %v300_v31 = vpop.xlane.xlu1 %299 }
 0x381   :  { %663 = vrcp.f32 %v300_v31 }
 0x384   :  { %v382_v32 = vpop.permute.xlu1 %381 }
 0x385   :  { %633 = vmatpush3.msra.mxu1 %v382_v32 }
 0x387   :  { %v662_v33 = vpop.eup %661 }
 0x388   :  { %v302_v34 = vmul.f32 %v662_v33, %v658_v26 }
 0x38a   :  { %630 = vmatmul.mubr.msk.f32.vlgmr.msra.gmra.mrb[2].mxu0 %vm282_vm2, %v302_v34 }
 0x38b   :  { %v664_v35 = vpop.eup %663 }
 0x38c   :  { %v304_v36 = vmul.f32 %v664_v35, %v660_v28 }
 0x38e   :  { %635 = vmatmul.mubr.msk.f32.vlgmr.msra.gmra.mrb[4].mxu1 %vm282_vm2, %v304_v36 }
 0x45d   :  { %v377_v44 = vpop.f32.mrb[2].mxu0 }
 0x45e   :  { %v631_v46 = vpop.f32.mrb[3].mxu0  ;;  %v457_v48 = vcombine.high %v377_v44, %v741_v8  ;;  %v464_v50 = vrot.slane %v377_v44, %v463_v45 }
 0x460   :  { %v471_v55 = vrot.slane %v457_v48, %v463_v45 }
 0x461   :  { %v453_v49 = vpop.f32.mrb[4].mxu1 }
 0x462   :  { %v472_v51 = vcombine.high %v453_v49, %v741_v8  ;;  %v479_v52 = vrot.slane %v453_v49, %v463_v45  ;;  %v636_v54 = vpop.f32.mrb[5].mxu1 }
 0x464   :  { %v486_v56 = vrot.slane %v472_v51, %v463_v45  ;;  %v487_v57 = vcombine.low %v464_v50, %v479_v52  ;;  %v488_v58 = vcombine.high %v464_v50, %v479_v52 }
 0x466   :  { %v495_v59 = vrot.slane %v487_v57, %v494_v53  ;;  %v503_v60 = vcombine.low %v471_v55, %v486_v56  ;;  %v504_v61 = vcombine.high %v471_v55, %v486_v56  ;;  %v502_v62 = vrot.slane %v488_v58, %v494_v53 }
 0x468   :  { %528 = vrot.lane.b32.xlu0 %v502_v62, %s744_s6  ;;  %v519_v63 = vcombine.high %v495_v59, %v741_v8  ;;  %v518_v0 = vrot.slane %v504_v61, %v494_v53  ;;  %v520_v1 = vcombine.high %v502_v62, %v741_v8  ;;  %v511_v2 = vrot.slane %v503_v60, %v494_v53 }
 0x46a   :  { %524 = vrot.lane.b32.xlu1 %v519_v63, %s747_s7  ;;  %v521_v3 = vcombine.high %v511_v2, %v741_v8  ;;  %v522_v4 = vcombine.high %v518_v0, %v741_v8 }
 0x46e   :  { %540 = vrot.lane.b32.xlu1 %v518_v0, %s744_s6 }
 0x472   :  { %532 = vrot.lane.b32.xlu1 %v520_v1, %s743_s1 }
 0x476   :  { %536 = vrot.lane.b32.xlu1 %v521_v3, %s747_s7 }
 0x47a   :  { %544 = vrot.lane.b32.xlu1 %v522_v4, %s743_s1 }
 0x4da   :  { %v529_v12 = vpop.permute.xlu0 %528 }
 0x4dc   :  { %v525_v5 = vpop.permute.xlu1 %524 }
 0x4dd   :  { %v547_v10 = vsel %vm46_vm0, %v495_v59, %v525_v5 }
 0x4de   :  { %v549_v13 = vsel %vm548_vm3, %v547_v10, %v529_v12 }
 0x4e0   :  { %v541_v6 = vpop.permute.xlu1 %540 }
 0x4e4   :  { %v533_v7 = vpop.permute.xlu1 %532 }
 0x4e5   :  { %v551_v16 = vsel %vm550_vm4, %v549_v13, %v533_v7 }
 0x4e8   :  { %v537_v9 = vpop.permute.xlu1 %536 }
 0x4e9   :  { %v552_v11 = vsel %vm46_vm0, %v511_v2, %v537_v9 }
 0x4ea   :  { %v553_v14 = vsel %vm548_vm3, %v552_v11, %v541_v6 }
 0x4ec   :  { %v545_v15 = vpop.permute.xlu1 %544 }
 0x4ed   :  { %v554_v8 = vsel %vm550_vm4, %v553_v14, %v545_v15 }
 0x4ee   :  { %v557_v17 = vcombine.low %v551_v16, %v554_v8 }
 0x4f0   :  { %591 = vst.sshfl [vmem:[#allocation7] sm:$0x33 pattern:$0x76325410] %v557_v17 }
 0x4f1   :  { %720 = shalt.err (!%p717_p6)
}
 0x4f2   :  { %s721_s13 = scalar_lea.hbm %s842_s2, 64 }
 0x4f3   :  { %p722_p7 = scmp.ne.s32.totalorder %s842_s2, %s721_s13  ;;  %p725_p8 = scmp.lt.u32.totalorder %s721_s13, %s842_s2 }
 0x4f5   :  { %p727_p9 = pnand %p725_p8, %p722_p7 }
 0x4f7   :  { %730 = shalt.err (!%p727_p9)
}
 0x4f8   :  { %576 = dma.vmem_to_hbm [thread:$0]  %s574_s9, 64, %s842_s2, [#allocation4]  }
 0x4f9   :  { %735 = dma.done.wait [#allocation4], 64  }
 0x4fa   :  { %736 = vsyncadd [#allocation4], 4294967232 }
 0x4fb   :  { %580 = vsyncpa [#allocation3], 1 }
 0x4fc   :  { %581 = vsyncpa [#allocation6], 1 }
 0x4fd   :  { %582 = vsyncpa [#allocation4], 1 }

</bundles_post_ra>
